<compile_context>
chip_gen: v6e
topology: v6e:2x2x1
jax: 0.10.0
libtpu: 0.0.40
codegen_flags: <defaults>
</compile_context>

<pallas_src>
import functools
import math

import jax
import jax.numpy as jnp
import numpy as np
from jax import lax
from jax.experimental import pallas as pl
from jax.experimental.pallas import tpu as pltpu

NEG_SLOPE = 0.01  # torch.nn.LeakyReLU default negative_slope


def make_masked_mlp_kernel(num_layers: int, negative_slope: float = NEG_SLOPE):
    """Fused kernel for `num_layers` masked linear layers.

    Kernel ref order: x_ref, then per layer (wm_ref, bias_ref), then out_ref.
      x_ref  : (batch_tile, d_in)   -- natural layout, dense DMA from HBM
      wm_ref : (out_l, in_l)        -- pre-masked weight (mask * W), resident
      b_ref  : (out_l, 1)           -- bias, broadcasts along lanes
      out    : (d_out, batch_tile)  -- lane-dense (batch on lanes)
    """

    def kernel(x_ref, *refs):
        out_ref = refs[-1]
        params = refs[:-1]

        # Layer 0: contract x's feature (minor) dim directly against the
        # pre-masked weight -> (out0, batch_tile).  This is the q @ k^T dot
        # pattern; it lets the kernel read x in natural layout (no wrapper
        # transpose pass) while producing a lane-dense activation.
        wm0 = params[0][...]            # (out0, d_in)
        b0 = params[1][...]             # (out0, 1)
        h = lax.dot_general(
            wm0, x_ref[...],
            dimension_numbers=(((1,), (1,)), ((), ())),
            preferred_element_type=jnp.float32) + b0        # (out0, tile)
        if num_layers > 1:
            h = jnp.maximum(h, negative_slope * h)          # LeakyReLU

        for l in range(1, num_layers):
            wm = params[2 * l][...]     # (out_l, in_l)
            b = params[2 * l + 1][...]  # (out_l, 1)
            # lane-dense masked linear: (out,in) @ (in,tile) + (out,1)
            h = jnp.dot(wm, h, preferred_element_type=jnp.float32) + b
            if l < num_layers - 1:
                h = jnp.maximum(h, negative_slope * h)      # LeakyReLU

        out_ref[...] = h.astype(out_ref.dtype)

    return kernel


def _choose_tile(batch: int, max_tile: int) -> int:
    """Lane tile for the batch axis.

    Multiple of 128, <= max_tile, and small enough that the grid has >= 2
    steps whenever batch > 128 (keeps both v7x TensorCores busy); when
    batch <= 2*max_tile the grid is exactly 2 and balanced.
    """
    if batch <= 128:
        return batch                       # single full-array block
    max_units = max(1, max_tile // 128)
    n128 = -(-batch // 128)
    units = min(max_units, -(-n128 // 2))  # at most ~half the batch per step
    return units * 128


def premask_params(weights, biases, masks):
    """Hoisted, call once: pre-masked weights and (out,1) biases."""
    wms = tuple(jnp.asarray(m, jnp.float32) * jnp.asarray(w, jnp.float32)
                for w, m in zip(weights, masks))
    bs = tuple(jnp.asarray(b, jnp.float32).reshape(-1, 1) for b in biases)
    return wms, bs


@functools.partial(jax.jit, static_argnames=("batch_tile",))
def masked_mlp_forward_premasked(x, wms, bs, *, batch_tile=8192):
    """Fused MaskedMLP forward on pre-masked params.

    x:   (B, sum(input_dims)) float32
    wms: tuple of (out_l, in_l) pre-masked weights
    bs:  tuple of (out_l, 1) biases
    returns: (B, sum(output_dims)) float32
    """
    x = x.astype(jnp.float32)
    B, d_in = x.shape
    num_layers = len(wms)
    d_out = wms[-1].shape[0]

    tile = _choose_tile(B, batch_tile)
    grid = (pl.cdiv(B, tile),)   # partial last block OK: batch cols independent

    args = [x]
    in_specs = [pl.BlockSpec((tile, d_in), lambda i: (i, 0))]
    for wm, b in zip(wms, bs):
        o, idim = wm.shape
        args.append(wm)                                     # (out, in)
        args.append(b)                                      # (out, 1)
        in_specs.append(pl.BlockSpec((o, idim), lambda i: (0, 0)))
        in_specs.append(pl.BlockSpec((o, 1), lambda i: (0, 0)))

    out_spec = pl.BlockSpec((d_out, tile), lambda i: (0, i))

    out_t = pl.pallas_call(
        make_masked_mlp_kernel(num_layers),
        out_shape=jax.ShapeDtypeStruct((d_out, B), jnp.float32),
        grid=grid,
        in_specs=in_specs,
        out_specs=out_spec,
        compiler_params=pltpu.CompilerParams(
            dimension_semantics=("parallel",)),
    )(*args)

    # Lane-dense (d_out, B) -> caller's (B, d_out). Single XLA transpose of
    # the (tiny-feature) output under jit; the larger input stream needs no
    # wrapper-side pass at all.
    return out_t.T


def masked_mlp_forward(x, weights, biases, masks, *, batch_tile=8192):
    """Convenience wrapper: premask (cheap) + jitted fused forward."""
    wms, bs = premask_params(weights, biases, masks)
    return masked_mlp_forward_premasked(jnp.asarray(x, jnp.float32), wms, bs,
                                        batch_tile=batch_tile)


def init_masked_mlp(key, input_dims, output_dims, layers=3, nodes_per_feature=8):
    """Builds degrees, masks and deterministically-initialized params.

    Masks follow the module exactly: mask = (deg_out[:,None] >= deg_in[None,:]).
    Weights use a kaiming-uniform-style bound 1/sqrt(fan_in). NOTE: the torch
    module zero-inits the *last* layer (output would be trivially constant);
    here we random-init it too so the kernel test is non-trivial.
    """
    in_degrees = np.concatenate(
        [np.full(d, i, dtype=np.int32) for i, d in enumerate(input_dims)])
    hidden_degrees = np.repeat(
        np.arange(len(input_dims), dtype=np.int32), nodes_per_feature)
    out_degrees = np.concatenate(
        [np.full(d, i, dtype=np.int32) for i, d in enumerate(output_dims)])

    layer_degrees = [in_degrees] + [hidden_degrees] * (layers - 1) + [out_degrees]

    weights, biases, masks = [], [], []
    for deg_in, deg_out in zip(layer_degrees[:-1], layer_degrees[1:]):
        mask = (deg_out[:, None] >= deg_in[None, :]).astype(np.float32)
        fan_in = len(deg_in)
        bound = 1.0 / math.sqrt(fan_in) if fan_in > 0 else 0.0
        key, wk, bk = jax.random.split(key, 3)
        W = jax.random.uniform(
            wk, (len(deg_out), len(deg_in)), jnp.float32, -bound, bound)
        b = jax.random.uniform(bk, (len(deg_out),), jnp.float32, -bound, bound)
        weights.append(W)
        biases.append(b)
        masks.append(jnp.asarray(mask))
    return weights, biases, masks


def masked_mlp_reference(x, weights, biases, masks):
    """Pure-JAX reference matching the torch forward()."""
    h = x
    n = len(weights)
    for l in range(n):
        wm = masks[l] * weights[l]
        h = h @ wm.T + biases[l]
        if l < n - 1:
            h = jnp.where(h > 0, h, NEG_SLOPE * h)
    return h


if __name__ == "__main__":
    key = jax.random.PRNGKey(0)

    # Small shapes consistent with the module:
    #   input_dims=[2,2,4] -> d_in=8; nodes_per_feature=8 -> hidden=24;
    #   output_dims=[2,2,4] -> d_out=8; layers=3.
    input_dims = [2, 2, 4]
    output_dims = [2, 2, 4]
    layers = 3
    nodes_per_feature = 8

    key, pkey, xkey, x2key = jax.random.split(key, 4)
    weights, biases, masks = init_masked_mlp(
        pkey, input_dims, output_dims, layers=layers,
        nodes_per_feature=nodes_per_feature)

    # Hoisted once (not per call), per perf review.
    wms, bs = premask_params(weights, biases, masks)

    d_in = sum(input_dims)

    # Aligned small batch: 2 grid steps of 128 lanes -> both v7x TCs get work.
    x = jax.random.normal(xkey, (256, d_in), jnp.float32)
    out = jax.block_until_ready(masked_mlp_forward_premasked(x, wms, bs))
    ref = masked_mlp_reference(x, weights, biases, masks)
    np.testing.assert_allclose(np.asarray(out), np.asarray(ref),
                               rtol=1e-5, atol=1e-5)

    # Ragged batch: exercises the partial last block (no jnp.pad / slice pass).
    x2 = jax.random.normal(x2key, (200, d_in), jnp.float32)
    out2 = jax.block_until_ready(masked_mlp_forward_premasked(x2, wms, bs))
    ref2 = masked_mlp_reference(x2, weights, biases, masks)
    np.testing.assert_allclose(np.asarray(out2), np.asarray(ref2),
                               rtol=1e-5, atol=1e-5)

    print("KERNEL_OK")
</pallas_src>

<mosaic_0001>
module attributes {stable_mosaic.version = 11 : i64} {
  func.func @kernel(%arg0: i32, %arg1: memref<128x8xf32, #tpu.memory_space<vmem>>, %arg2: memref<24x8xf32, #tpu.memory_space<vmem>>, %arg3: memref<24x1xf32, #tpu.memory_space<vmem>>, %arg4: memref<24x24xf32, #tpu.memory_space<vmem>>, %arg5: memref<24x1xf32, #tpu.memory_space<vmem>>, %arg6: memref<8x24xf32, #tpu.memory_space<vmem>>, %arg7: memref<8x1xf32, #tpu.memory_space<vmem>>, %arg8: memref<8x128xf32, #tpu.memory_space<vmem>>) attributes {dimension_semantics = [#tpu.dimension_semantics<parallel>], iteration_bounds = array<i64: 2>, scalar_prefetch = 0 : i64, scratch_operands = 0 : i64, tpu.core_type = #tpu.core_type<tc>, window_params = [{transform_indices = @transform_0, window_bounds = array<i64: 128, 8>}, {pipeline_mode = #tpu.pipeline_mode<synchronous>, transform_indices = @transform_1, window_bounds = array<i64: 24, 8>}, {pipeline_mode = #tpu.pipeline_mode<synchronous>, transform_indices = @transform_2, window_bounds = array<i64: 24, 1>}, {pipeline_mode = #tpu.pipeline_mode<synchronous>, transform_indices = @transform_3, window_bounds = array<i64: 24, 24>}, {pipeline_mode = #tpu.pipeline_mode<synchronous>, transform_indices = @transform_4, window_bounds = array<i64: 24, 1>}, {pipeline_mode = #tpu.pipeline_mode<synchronous>, transform_indices = @transform_5, window_bounds = array<i64: 8, 24>}, {pipeline_mode = #tpu.pipeline_mode<synchronous>, transform_indices = @transform_6, window_bounds = array<i64: 8, 1>}, {transform_indices = @transform_7, window_bounds = array<i64: 8, 128>}]} {
    %c0 = arith.constant 0 : index
    %c0_0 = arith.constant 0 : index
    %0 = vector.load %arg2[%c0, %c0_0] : memref<24x8xf32, #tpu.memory_space<vmem>>, vector<24x8xf32>
    %c0_1 = arith.constant 0 : index
    %c0_2 = arith.constant 0 : index
    %1 = vector.load %arg3[%c0_1, %c0_2] : memref<24x1xf32, #tpu.memory_space<vmem>>, vector<24x1xf32>
    %c0_3 = arith.constant 0 : index
    %c0_4 = arith.constant 0 : index
    %2 = vector.load %arg1[%c0_3, %c0_4] : memref<128x8xf32, #tpu.memory_space<vmem>>, vector<128x8xf32>
    %cst = arith.constant dense<0.000000e+00> : vector<24x128xf32>
    %3 = tpu.matmul %0, %2, %cst {dimension_numbers = #tpu.dot_dimension_numbers<[1], [1], [0], [0], [0, 0, 1, 0], [], []>} : vector<24x8xf32>, vector<128x8xf32>, vector<24x128xf32> -> vector<24x128xf32>
    %4 = vector.broadcast %1 : vector<24x1xf32> to vector<24x128xf32>
    %5 = arith.addf %3, %4 : vector<24x128xf32>
    %cst_5 = arith.constant 0.00999999977 : f32
    %6 = vector.broadcast %cst_5 : f32 to vector<24x128xf32>
    %7 = arith.mulf %6, %5 : vector<24x128xf32>
    %8 = arith.maximumf %5, %7 : vector<24x128xf32>
    %c0_6 = arith.constant 0 : index
    %c0_7 = arith.constant 0 : index
    %9 = vector.load %arg4[%c0_6, %c0_7] : memref<24x24xf32, #tpu.memory_space<vmem>>, vector<24x24xf32>
    %c0_8 = arith.constant 0 : index
    %c0_9 = arith.constant 0 : index
    %10 = vector.load %arg5[%c0_8, %c0_9] : memref<24x1xf32, #tpu.memory_space<vmem>>, vector<24x1xf32>
    %cst_10 = arith.constant dense<0.000000e+00> : vector<24x128xf32>
    %11 = tpu.matmul %9, %8, %cst_10 {dimension_numbers = #tpu.dot_dimension_numbers<[1], [0], [0], [1], [0, 0, 1, 1], [], []>} : vector<24x24xf32>, vector<24x128xf32>, vector<24x128xf32> -> vector<24x128xf32>
    %12 = vector.broadcast %10 : vector<24x1xf32> to vector<24x128xf32>
    %13 = arith.addf %11, %12 : vector<24x128xf32>
    %cst_11 = arith.constant 0.00999999977 : f32
    %14 = vector.broadcast %cst_11 : f32 to vector<24x128xf32>
    %15 = arith.mulf %14, %13 : vector<24x128xf32>
    %16 = arith.maximumf %13, %15 : vector<24x128xf32>
    %c0_12 = arith.constant 0 : index
    %c0_13 = arith.constant 0 : index
    %17 = vector.load %arg6[%c0_12, %c0_13] : memref<8x24xf32, #tpu.memory_space<vmem>>, vector<8x24xf32>
    %c0_14 = arith.constant 0 : index
    %c0_15 = arith.constant 0 : index
    %18 = vector.load %arg7[%c0_14, %c0_15] : memref<8x1xf32, #tpu.memory_space<vmem>>, vector<8x1xf32>
    %cst_16 = arith.constant dense<0.000000e+00> : vector<8x128xf32>
    %19 = tpu.matmul %17, %16, %cst_16 {dimension_numbers = #tpu.dot_dimension_numbers<[1], [0], [0], [1], [0, 0, 1, 1], [], []>} : vector<8x24xf32>, vector<24x128xf32>, vector<8x128xf32> -> vector<8x128xf32>
    %20 = vector.broadcast %18 : vector<8x1xf32> to vector<8x128xf32>
    %21 = arith.addf %19, %20 : vector<8x128xf32>
    %c0_17 = arith.constant 0 : index
    %c0_18 = arith.constant 0 : index
    %22 = vector.load %arg8[%c0_17, %c0_18] : memref<8x128xf32, #tpu.memory_space<vmem>>, vector<8x128xf32>
    tpu.vector_store %arg8[%c0_17, %c0_18], %21 {strides = array<i32>} : memref<8x128xf32, #tpu.memory_space<vmem>>, vector<8x128xf32>,
    return
  }
  func.func @transform_0(%arg0: i32) -> (i32, i32) {
    %c0_i32 = arith.constant 0 : i32
    %c0_i32_0 = arith.constant 0 : i32
    return %arg0, %c0_i32 : i32, i32
  }
  func.func @transform_1(%arg0: i32) -> (i32, i32) {
    %c0_i32 = arith.constant 0 : i32
    %c0_i32_0 = arith.constant 0 : i32
    %c0_i32_1 = arith.constant 0 : i32
    return %c0_i32, %c0_i32_0 : i32, i32
  }
  func.func @transform_2(%arg0: i32) -> (i32, i32) {
    %c0_i32 = arith.constant 0 : i32
    %c0_i32_0 = arith.constant 0 : i32
    %c0_i32_1 = arith.constant 0 : i32
    return %c0_i32, %c0_i32_0 : i32, i32
  }
  func.func @transform_3(%arg0: i32) -> (i32, i32) {
    %c0_i32 = arith.constant 0 : i32
    %c0_i32_0 = arith.constant 0 : i32
    %c0_i32_1 = arith.constant 0 : i32
    return %c0_i32, %c0_i32_0 : i32, i32
  }
  func.func @transform_4(%arg0: i32) -> (i32, i32) {
    %c0_i32 = arith.constant 0 : i32
    %c0_i32_0 = arith.constant 0 : i32
    %c0_i32_1 = arith.constant 0 : i32
    return %c0_i32, %c0_i32_0 : i32, i32
  }
  func.func @transform_5(%arg0: i32) -> (i32, i32) {
    %c0_i32 = arith.constant 0 : i32
    %c0_i32_0 = arith.constant 0 : i32
    %c0_i32_1 = arith.constant 0 : i32
    return %c0_i32, %c0_i32_0 : i32, i32
  }
  func.func @transform_6(%arg0: i32) -> (i32, i32) {
    %c0_i32 = arith.constant 0 : i32
    %c0_i32_0 = arith.constant 0 : i32
    %c0_i32_1 = arith.constant 0 : i32
    return %c0_i32, %c0_i32_0 : i32, i32
  }
  func.func @transform_7(%arg0: i32) -> (i32, i32) {
    %c0_i32 = arith.constant 0 : i32
    %c0_i32_0 = arith.constant 0 : i32
    return %c0_i32, %arg0 : i32, i32
  }
}

</mosaic_0001>

<bundles_post_ra>
// kernel: masked_mlp_forward_premasked.1
= control target key start
LH: loop header
LB: loop body
LE: loop exit
PB: predicated region body
PF: predicated region fallthrough
CT: control target
= control target key end

     0   :  { %12 = vsyncpa [#allocation3], 0  ;;  %s1220_s0 = inlined_call_operand.vmem [shape: f32[256,8], index: 0, kind: input, shape index: {}]   ;;  %s1221_s1 = inlined_call_operand.vmem [shape: f32[24,8], index: 1, kind: input, shape index: {}]   ;;  %s1222_s2 = inlined_call_operand.vmem [shape: f32[24,1], index: 2, kind: input, shape index: {}]   ;;  %s1223_s3 = inlined_call_operand.vmem [shape: f32[24,24], index: 3, kind: input, shape index: {}]   ;;  %s1224_s4 = inlined_call_operand.vmem [shape: f32[24,1], index: 4, kind: input, shape index: {}]   ;;  %s1225_s5 = inlined_call_operand.vmem [shape: f32[8,24], index: 5, kind: input, shape index: {}]   ;;  %s1226_s6 = inlined_call_operand.vmem [shape: f32[8,1], index: 6, kind: input, shape index: {}]   ;;  %s1227_s7 = inlined_call_operand.hbm [shape: f32[8,256], index: 7, kind: output, shape index: {}]  }
   0x1   :  { %14 = vsyncpa [#allocation3 + $0x1], 0  ;;  %s1009_s24 = smov 0   ;;  %s1011_s25 = smov 0  }
   0x2   :  { %s1013_s26 = smov 0   ;;  %s1015_s27 = smov 0  }
   0x3 LB: > { %s1030_s28 = sadd.s32 4294967295, %s963_s27   ;;  %s731_s29 = sadd.s32 4294967294, %s963_s27   ;;  %s963_s27 = sphi %s1015_s27, %s1233_s27   ;;  %s959_s26 = sphi %s1013_s26, %s1232_s26   ;;  %s955_s25 = sphi %s1011_s25, %s1231_s25   ;;  %s951_s24 = sphi %s1009_s24, %s1230_s24  }
   0x4   : > { %s1034_s30 = sadd.s32 1, %s963_s27   ;;  %s179_s8 = sadd.s32 1, %s959_s26 }
   0x5   : > { %s176_s9 = ssub.s32 %s963_s27, %s1034_s30  ;;  %p189_p0 = scmp.ne.s32.totalorder %s959_s26, %s955_s25 }
   0x6   : > { %p177_p1 = scmp.eq.s32.totalorder %s176_s9, 0  ;;  %p190_p2 = scmp.eq.s32.totalorder %s1030_s28, 1 }
   0x7   : > { %p195_p3 = scmp.ne.s32.totalorder %s955_s25, %s951_s24  ;;  %p196_p4 = scmp.eq.s32.totalorder %s731_s29, 1 }
   0x8   : > { %s1045_s10 = scalar_select %p177_p1, %s959_s26, %s179_s8  }
   0x9   : > { %p1047_p5 = por %p190_p2, %p189_p0  ;;  %p1051_p6 = por %p196_p4, %p195_p3 }
   0xa   : > { %p734_p7 = scmp.ge.s32.totalorder %s963_s27, 1  ;;  %p241_p8 = scmp.lt.s32.totalorder %s963_s27, 3 }
   0xc   : > { %p242_p9 = pnand %p734_p7, %p241_p8 }
   0xd   : > { %s736_s13 = sshll.u32 (!%p242_p9), %s1030_s28, 4  ;;  %s270_s18 = sand.u32 (!%p242_p9), 1, %s955_s25  }
   0xe   : > { %245 = sbr.rel (%p242_p9) target bundleno = 719 (0x2cf), region = 48  ;;  %p274_p10 = scmp.lt.s32.totalorder (!%p242_p9), %s736_s13, 31 }
   0xf   : > { %s735_s19 = sshll.u32 (!%p242_p9), %s270_s18, 3  ;;  %s762_s20 = sshll.u32 (!%p242_p9), %s1030_s28, 7 }
  0x10   : > { %s272_s21 = scalar_lea.vmem (!%p242_p9), [#allocation2], %s735_s19  ;;  %s659_s9 = scalar_lea.sflag (!%p242_p9), [#allocation3], %s270_s18 }
  0x11   : > { %s968_s28 = smov (!%p242_p9), [#allocation2]  }
  0x13   : > { %v965_v0 = vmov 0.0   ;;  %vm966_vm0 = vmmov 0   ;;  %v284_v1 = vld [vmem:[%s1222_s2 + $0x10] sm:$0xff]  ;;  %v967_v2 = vmov 0   ;;  %v282_v3 = vld [vmem:[%s1222_s2] sm:$0xff]  ;;  %s1235_s13 = smov (!%p274_p10, %s736_s13), 31 }
  0x14   : > { %794 = vmatprep.subr.mxu0 %v965_v0  ;;  %826 = vmatprep.mubr.msk.f32.mxu0 %vm966_vm0, %v965_v0  ;;  %v283_v4 = vld [vmem:[%s1222_s2 + $0x8] sm:$0xff]  ;;  %v465_v5 = vld [vmem:[%s1224_s4 + $0x10] sm:$0xff]  ;;  %s737_s22 = sshll.u32 %s1235_s13, 3  ;;  %vm316_vm1 = vcmask 64512   ;;  %v463_v8 = vld [vmem:[%s1224_s4] sm:$0xff]  ;;  %vm481_vm2 = vcmask 195584  }
  0x15   : > { %901 = vset.pattern.permute.xlu0 %v967_v2  ;;  %902 = vset.pattern.permute.xlu1 %v967_v2  ;;  %s1079_s8 = scalar_lea.vmem %s1220_s0, %s737_s22  ;;  %v464_v7 = vld [vmem:[%s1224_s4 + $0x8] sm:$0xff]  ;;  %v578_v10 = vld [vmem:[%s1226_s6] sm:$0xff]  ;;  %v281_v27 = vld [vmem:[%s1221_s1 + $0x10] sm:$0xff]  ;;  %s672_s22 = sshll.u32 %s272_s21, 4  ;;  %s673_s22 = int_to_ptr.vmem [resolvable:$true] %s672_s22 }
  0x16   : > { %313 = vperm.xlu0 %901, %v284_v1   ;;  %303 = vperm.xlu1 %902, %v282_v3   ;;  %v300_v6 = vld [vmem:[%s1079_s8 + $0x78] sm:$0xff]  ;;  %v299_v9 = vld [vmem:[%s1079_s8 + $0x70] sm:$0xff]  ;;  %v298_v11 = vld [vmem:[%s1079_s8 + $0x68] sm:$0xff]  ;;  %s903_s14 = scalar_lea.vmem %s673_s22, 128  ;;  %s907_s13 = sshll.u32 %s968_s28, 4  ;;  %s908_s13 = int_to_ptr.vmem [resolvable:$false] %s907_s13 }
  0x17   : > { %835 = vmatprep.subr.mxu1 %v965_v0  ;;  %841 = vmatprep.mubr.msk.f32.mxu1 %vm966_vm0, %v965_v0  ;;  %v297_v12 = vld [vmem:[%s1079_s8 + $0x60] sm:$0xff]  ;;  %v296_v13 = vld [vmem:[%s1079_s8 + $0x58] sm:$0xff]  ;;  %v295_v14 = vld [vmem:[%s1079_s8 + $0x50] sm:$0xff]  ;;  %p904_p11 = scmp.ne.s32.totalorder %s673_s22, %s903_s14  ;;  %s909_s15 = scalar_lea.vmem %s908_s13, 256 }
  0x18   : > { %795 = vmatpush3.xpose.msk.msra.mxu0 %vm316_vm1, %v300_v6  ;;  %v294_v15 = vld [vmem:[%s1079_s8 + $0x48] sm:$0xff]  ;;  %v293_v16 = vld [vmem:[%s1079_s8 + $0x40] sm:$0xff]  ;;  %v292_v17 = vld [vmem:[%s1079_s8 + $0x38] sm:$0xff]  ;;  %p910_p0 = scmp.lt.s32.totalorder %s673_s22, %s908_s13  ;;  %p911_p1 = scmp.lt.s32.totalorder %s909_s15, %s903_s14 }
  0x19   : > { %796 = vmatprep.subr.mxu0 %v965_v0  ;;  %v291_v18 = vld [vmem:[%s1079_s8 + $0x30] sm:$0xff]  ;;  %v290_v19 = vld [vmem:[%s1079_s8 + $0x28] sm:$0xff]  ;;  %v289_v20 = vld [vmem:[%s1079_s8 + $0x20] sm:$0xff]  ;;  %p905_p12 = pnand %p904_p11, %p1047_p5 }
  0x1a   : > { %308 = vperm.xlu0 %901, %v283_v4   ;;  %478 = vperm.xlu1 %902, %v465_v5   ;;  %v288_v21 = vld [vmem:[%s1079_s8 + $0x18] sm:$0xff]  ;;  %v287_v22 = vld [vmem:[%s1079_s8 + $0x10] sm:$0xff]  ;;  %v286_v23 = vld [vmem:[%s1079_s8 + $0x8] sm:$0xff]  ;;  %p912_p2 = por %p911_p1, %p910_p0 }
  0x1b   : > { %v285_v24 = vld [vmem:[%s1079_s8] sm:$0xff]  ;;  %v280_v26 = vld [vmem:[%s1221_s1 + $0x8] sm:$0xff]  ;;  %v462_v48 = vld [vmem:[%s1223_s3 + $0x10] sm:$0xff]  ;;  %s1185_s8 = scalar_lea.hbm %s1227_s7, %s762_s20  ;;  %p906_p13 = pneg %p905_p12 }
  0x1c   : > { %797 = vmatpush3.xpose.msk.msra.mxu0 %vm316_vm1, %v299_v9  ;;  %v279_v25 = vld [vmem:[%s1221_s1] sm:$0xff]  ;;  %v461_v47 = vld [vmem:[%s1223_s3 + $0x8] sm:$0xff] }
  0x1d   : > { %798 = vmatprep.subr.mxu0 %v965_v0  ;;  %v460_v46 = vld [vmem:[%s1223_s3] sm:$0xff]  ;;  %p913_p3 = pnand %p912_p2, %p906_p13 }
  0x1e   : > { %473 = vperm.xlu0 %901, %v464_v7   ;;  %468 = vperm.xlu1 %902, %v463_v8   ;;  %v577_v4 = vld [vmem:[%s1225_s5] sm:$0xff] }
  0x20   : > { %799 = vmatpush3.xpose.msk.msra.mxu0 %vm316_vm1, %v298_v11 }
  0x21   : > { %800 = vmatprep.subr.mxu0 %v965_v0 }
  0x22   : > { %581 = vperm.xlu0 %901, %v578_v10  }
  0x24   : > { %801 = vmatpush3.xpose.msk.msra.mxu0 %vm316_vm1, %v297_v12 }
  0x25   : > { %802 = vmatprep.subr.mxu0 %v965_v0 }
  0x28   : > { %803 = vmatpush3.xpose.msk.msra.mxu0 %vm316_vm1, %v296_v13 }
  0x29   : > { %804 = vmatprep.subr.mxu0 %v965_v0 }
  0x2c   : > { %805 = vmatpush3.xpose.msk.msra.mxu0 %vm316_vm1, %v295_v14 }
  0x2d   : > { %806 = vmatprep.subr.mxu0 %v965_v0 }
  0x30   : > { %807 = vmatpush3.xpose.msk.msra.mxu0 %vm316_vm1, %v294_v15 }
  0x31   : > { %808 = vmatprep.subr.mxu0 %v965_v0 }
  0x34   : > { %809 = vmatpush3.xpose.msk.msra.mxu0 %vm316_vm1, %v293_v16 }
  0x35   : > { %810 = vmatprep.subr.mxu0 %v965_v0 }
  0x38   : > { %811 = vmatpush3.xpose.msk.msra.mxu0 %vm316_vm1, %v292_v17 }
  0x39   : > { %812 = vmatprep.subr.mxu0 %v965_v0 }
  0x3c   : > { %813 = vmatpush3.xpose.msk.msra.mxu0 %vm316_vm1, %v291_v18 }
  0x3d   : > { %814 = vmatprep.subr.mxu0 %v965_v0 }
  0x40   : > { %815 = vmatpush3.xpose.msk.msra.mxu0 %vm316_vm1, %v290_v19 }
  0x41   : > { %816 = vmatprep.subr.mxu0 %v965_v0 }
  0x44   : > { %817 = vmatpush3.xpose.msk.msra.mxu0 %vm316_vm1, %v289_v20 }
  0x45   : > { %818 = vmatprep.subr.mxu0 %v965_v0 }
  0x48   : > { %819 = vmatpush3.xpose.msk.msra.mxu0 %vm316_vm1, %v288_v21 }
  0x49   : > { %820 = vmatprep.subr.mxu0 %v965_v0 }
  0x4c   : > { %821 = vmatpush3.xpose.msk.msra.mxu0 %vm316_vm1, %v287_v22 }
  0x4d   : > { %822 = vmatprep.subr.mxu0 %v965_v0 }
  0x50   : > { %823 = vmatpush3.xpose.msk.msra.mxu0 %vm316_vm1, %v286_v23 }
  0x51   : > { %824 = vmatprep.subr.mxu0 %v965_v0 }
  0x54   : > { %825 = vmatpush3.xpose.msk.msra.mxu0 %vm316_vm1, %v285_v24 }
  0x57   : > { %827 = vmatmul.mubr.msk.f32.vlgmr.msra.gmra.mxu0 %vm316_vm1, %v279_v25 }
  0x58   : > { %829 = vmatprep.mubr.msk.f32.mxu0 %vm966_vm0, %v965_v0 }
  0x5b   : > { %830 = vmatmul.mubr.msk.f32.gmra.mxu0 %vm316_vm1, %v280_v26 }
  0x5c   : > { %832 = vmatprep.mubr.msk.f32.mxu0 %vm966_vm0, %v965_v0 }
  0x5f   : > { %833 = vmatmul.mubr.msk.f32.gmra.mxu0 %vm316_vm1, %v281_v27 }
  0x91   : > { %v314_v28 = vpop.permute.xlu0 %313  ;;  %v304_v32 = vpop.permute.xlu1 %303 }
  0x95   : > { %v309_v33 = vpop.permute.xlu0 %308  ;;  %v479_v50 = vpop.permute.xlu1 %478 }
  0x99   : > { %v474_v53 = vpop.permute.xlu0 %473  ;;  %v469_v56 = vpop.permute.xlu1 %468 }
  0x9d   : > { %v582_v5 = vpop.permute.xlu0 %581 }
 0x117   : > { %v440_v29 = vpop.f32.mrf.mxu0 }
 0x118   : > { %v441_v37 = vadd.f32 %v440_v29, %v304_v32 }
 0x119   : > { %v828_v30 = vpop.f32.mrf.mxu0 }
 0x11a   : > { %v454_v42 = vmul.f32 0.01, %v441_v37 }
 0x11b   : > { %v445_v31 = vpop.f32.mrf.mxu0 }
 0x11c   : > { %v446_v35 = vadd.f32 %v445_v31, %v309_v33  ;;  %v457_v45 = vmax.f32 %v441_v37, %v454_v42 }
 0x11d   : > { %v831_v34 = vpop.f32.mrf.mxu0 }
 0x11e   : > { %v455_v40 = vmul.f32 0.01, %v446_v35 }
 0x11f   : > { %v450_v36 = vpop.f32.mrf.mxu0 }
 0x120   : > { %v451_v38 = vadd.f32 %v450_v36, %v314_v28  ;;  %v458_v44 = vmax.f32 %v446_v35, %v455_v40 }
 0x121   : > { %v834_v39 = vpop.f32.mrf.mxu0 }
 0x122   : > { %v456_v41 = vmul.f32 0.01, %v451_v38 }
 0x124   : > { %v459_v43 = vmax.f32 %v451_v38, %v456_v41 }
 0x126   : > { %836 = vmatpush3.msra.mxu1 %v459_v43 }
 0x127   : > { %837 = vmatprep.subr.mxu1 %v965_v0 }
 0x128   : > { %838 = vmatpush3.msra.mxu1 %v458_v44 }
 0x129   : > { %839 = vmatprep.subr.mxu1 %v965_v0 }
 0x12a   : > { %840 = vmatpush3.msra.mxu1 %v457_v45 }
 0x12b   : > { %842 = vmatmul.mubr.msk.f32.vlgmr.msra.gmra.mxu1 %vm481_vm2, %v460_v46  ;;  %850 = vmatprep.subr.mxu1 %v965_v0 }
 0x12c   : > { %844 = vmatprep.mubr.msk.f32.mxu1 %vm966_vm0, %v965_v0 }
 0x12f   : > { %845 = vmatmul.mubr.msk.f32.gmra.mxu1 %vm481_vm2, %v461_v47 }
 0x130   : > { %847 = vmatprep.mubr.msk.f32.mxu1 %vm966_vm0, %v965_v0 }
 0x133   : > { %848 = vmatmul.mubr.msk.f32.gmra.mxu1 %vm481_vm2, %v462_v48 }
 0x134   : > { %856 = vmatprep.mubr.msk.f32.mxu1 %vm966_vm0, %v965_v0 }
 0x1eb   : > { %v557_v49 = vpop.f32.mrf.mxu1 }
 0x1ec   : > { %v558_v58 = vadd.f32 %v557_v49, %v469_v56 }
 0x1ed   : > { %v843_v51 = vpop.f32.mrf.mxu1 }
 0x1ee   : > { %v571_v63 = vmul.f32 0.01, %v558_v58 }
 0x1ef   : > { %v562_v52 = vpop.f32.mrf.mxu1 }
 0x1f0   : > { %v563_v55 = vadd.f32 %v562_v52, %v474_v53  ;;  %v574_v3 = vmax.f32 %v558_v58, %v571_v63 }
 0x1f1   : > { %v846_v54 = vpop.f32.mrf.mxu1 }
 0x1f2   : > { %v572_v61 = vmul.f32 0.01, %v563_v55 }
 0x1f3   : > { %v567_v57 = vpop.f32.mrf.mxu1 }
 0x1f4   : > { %v568_v59 = vadd.f32 %v567_v57, %v479_v50  ;;  %v575_v2 = vmax.f32 %v563_v55, %v572_v61 }
 0x1f5   : > { %v849_v60 = vpop.f32.mrf.mxu1 }
 0x1f6   : > { %v573_v62 = vmul.f32 0.01, %v568_v59 }
 0x1f8   : > { %v576_v1 = vmax.f32 %v568_v59, %v573_v62 }
 0x1fa   : > { %851 = vmatpush3.msra.mxu1 %v576_v1 }
 0x1fb   : > { %852 = vmatprep.subr.mxu1 %v965_v0 }
 0x1fc   : > { %853 = vmatpush3.msra.mxu1 %v575_v2 }
 0x1fd   : > { %854 = vmatprep.subr.mxu1 %v965_v0 }
 0x1fe   : > { %855 = vmatpush3.msra.mxu1 %v574_v3 }
 0x1ff   : > { %857 = vmatmul.mubr.msk.f32.vlgmr.msra.gmra.mxu1 %vm481_vm2, %v577_v4 }
 0x2bf   : > { %v653_v6 = vpop.f32.mrf.mxu1 }
 0x2c0   : > { %v654_v7 = vadd.f32 %v653_v6, %v582_v5 }
 0x2c1   : > { %v858_v8 = vpop.f32.mrf.mxu1 }
 0x2c2   : > { %657 = vst [vmem:[%s272_s21] sm:$0xff] %v654_v7 }
 0x2c3   : > { %916 = shalt.err (!%p913_p3)
}
 0x2c4   : > { %s917_s16 = scalar_lea.hbm %s1185_s8, 128  ;;  %s921_s19 = scalar_lea.hbm %s1227_s7, 256 }
 0x2c5   : > { %p918_p4 = scmp.ne.s32.totalorder %s1185_s8, %s917_s16  ;;  %p922_p9 = scmp.lt.s32.totalorder %s1185_s8, %s1227_s7 }
 0x2c6   : > { %p923_p10 = scmp.lt.s32.totalorder %s921_s19, %s917_s16 }
 0x2c7   : > { %p919_p7 = pnand %p918_p4, %p1047_p5 }
 0x2c8   : > { %p924_p11 = por %p923_p10, %p922_p9 }
 0x2c9   : > { %p920_p8 = pneg %p919_p7 }
 0x2cb   : > { %p925_p12 = pnand %p924_p11, %p920_p8 }
 0x2cd   : > { %928 = shalt.err (!%p925_p12)
}
 0x2ce   : > { %859 = dma.vmem_to_hbm [thread:$0]  (%p1047_p5), %s673_s22, 128, %s1185_s8, %s659_s9  }
 0x2cf PF: > { %p865_p13 = scmp.ge.s32.totalorder %s963_s27, 2  ;;  %s684_s23 = sand.u32 1, %s951_s24  }
 0x2d0   : > { %s685_s29 = scalar_lea.sflag [#allocation3], %s684_s23 }
 0x2d1   : > { %p862_p0 = pnand %p865_p13, %p1051_p6 }
 0x2d3   : > { %p863_p1 = pneg %p862_p0 }
 0x2d5   : > { %946 = dma.done.wait (%p863_p1), %s685_s29, 128  }
 0x2d6   : > { %948 = vsyncadd (%p863_p1), %s685_s29, 4294967168  ;;  %p17_p2 = scmp.ge.s32.totalorder %s1034_s30, 4   ;;  %s1230_s24 = smov %s955_s25 }
 0x2d7   : > { %s1231_s25 = smov %s959_s26  ;;  %s1232_s26 = smov %s1045_s10 }
 0x2d8   : > { %s1233_s27 = smov %s1034_s30  ;;  %19 = sbr.rel (!%p17_p2) target bundleno = 3 (0x3), region = 83 }
 0x2dd   :  { %690 = vsyncpa [#allocation3], 1 }
 0x2de   :  { %692 = vsyncpa [#allocation3 + $0x1], 1 }

</bundles_post_ra>
